<compile_context>
chip_gen: v5e
topology: v5e:2x2
jax: 0.10.0
libtpu: 0.0.40
codegen_flags: <defaults>
</compile_context>

<pallas_src>
import jax
import jax.numpy as jnp
from jax.experimental import pallas as pl
from jax.experimental.pallas import tpu as pltpu


# --- atan constants -----------------------------------------------------------
_TAN_PI_8 = 0.41421356237309503   # tan(pi/8) = sqrt(2) - 1
_PI_4 = 0.7853981633974483
_PI_2 = 1.5707963267948966
_PI = 3.141592653589793
# Cephes atanf minimax coefficients, valid for |t| <= tan(pi/8).
_P0 = 8.05374449538e-2
_P1 = -1.38776856032e-1
_P2 = 1.99777106478e-1
_P3 = -3.33329491539e-1
_F32_TINY = 1.1754944e-38         # smallest normal float32 (guards 0/0 -> 0)


def _sincos_to_angle_kernel(x_ref, o_ref):
    # x_ref block: (TB, 2, TR, L); o_ref block: (TB, TR, L)
    sin = x_ref[:, 0].astype(jnp.float32)   # (TB, TR, L)
    cos = x_ref[:, 1].astype(jnp.float32)   # (TB, TR, L)

    ay = jnp.abs(sin)
    ax = jnp.abs(cos)
    a = jnp.minimum(ay, ax)
    b = jnp.maximum(ay, ax)

    # Second range reduction without an extra divide:
    #   t = a/b            if a/b <= tan(pi/8)
    #   t = (a-b)/(a+b)    otherwise  (then add pi/4)
    reduce2 = a > b * _TAN_PI_8
    num = jnp.where(reduce2, a - b, a)
    den = jnp.where(reduce2, a + b, b)
    den = jnp.maximum(den, _F32_TINY)        # atan2(0, 0) -> 0, no inf/NaN

    # Divide on the EUP: approx reciprocal (~12 bit) + one Newton-Raphson step.
    r = pl.reciprocal(den, approx=True)
    r = r * (2.0 - den * r)
    t = num * r                              # |t| <= tan(pi/8)

    # Odd minimax polynomial (Horner) on the VPU.
    z = t * t
    poly = (((_P0 * z + _P1) * z + _P2) * z + _P3) * z * t + t

    phi = jnp.where(reduce2, _PI_4 + poly, poly)   # atan(a/b) in [0, pi/4]
    phi = jnp.where(ay > ax, _PI_2 - phi, phi)     # restore |t| > 1
    phi = jnp.where(cos < 0.0, _PI - phi, phi)     # left half-plane
    phi = jnp.where(sin < 0.0, -phi, phi)          # lower half-plane

    o_ref[...] = phi.astype(o_ref.dtype)


# Below this many total output elements, a single grid step is cheapest
# (per-step overhead dominates; splitting across TCs would not pay off).
_SMALL_ELEMS = 64 * 1024


def _run_flat(xr):
    """xr: (B, 2, R, L) -> (B, R, L) angles.  L should be lane-dense
    (multiple of 128) when possible; otherwise edge stores are masked."""
    B, _, R, L = xr.shape
    dtype = xr.dtype
    itemsize = jnp.dtype(dtype).itemsize
    total = B * R * L

    # Dtype-aware per-step budget: ~2 MiB of per-channel input bytes, capped
    # at 512K output elements so f32 temporaries stay well inside v7x VMEM.
    tile_elems = min((2 << 20) // itemsize, 512 * 1024)

    if total <= _SMALL_ELEMS:
        tb, tr = B, R                       # one step
    else:
        tb = 1                              # batch axis gives >=2 steps if B>=2
        if B >= 2:
            tr_budget = tile_elems // L
        else:
            # Single batch element: force a row split so the grid has >=2
            # steps along a "parallel" axis (keeps v7x's second TC busy).
            tr_budget = min(tile_elems // L, pl.cdiv(R, 2))
        tr = max(8, (tr_budget // 8) * 8)   # multiple of 8 (sublane rule)
        tr = min(tr, R)                     # or the full row extent

    grid = (pl.cdiv(B, tb), pl.cdiv(R, tr))

    n = total
    cost = pl.CostEstimate(
        flops=32 * n,                       # range reduction + NR + poly + selects
        transcendentals=n,                  # one approx reciprocal per element
        bytes_accessed=3 * n * itemsize,    # 2 channels in + 1 out
    )

    return pl.pallas_call(
        _sincos_to_angle_kernel,
        out_shape=jax.ShapeDtypeStruct((B, R, L), dtype),
        grid=grid,
        in_specs=[pl.BlockSpec((tb, 2, tr, L), lambda bi, ri: (bi, 0, ri, 0))],
        out_specs=pl.BlockSpec((tb, tr, L), lambda bi, ri: (bi, ri, 0)),
        compiler_params=pltpu.CompilerParams(
            dimension_semantics=("parallel", "parallel"),
            vmem_limit_bytes=48 * 1024 * 1024,
        ),
        cost_estimate=cost,
    )(xr)


def sincos_to_angle(x):
    """x: (B, 2, H, W) -> (B, H, W), angle = atan2(x[:, 0], x[:, 1])."""
    B, C, H, W = x.shape
    assert C == 2, "SinCosToAngle expects 2 channels (sin, cos)"
    total = H * W

    # Pick a lane-dense last dim L (multiple of 128) that divides H*W so all
    # output stores are unmasked full-lane vst's.
    lane = 0
    for cand in (1024, 512, 256, 128):
        if total % cand == 0:
            lane = cand
            break

    if lane:
        out = _run_flat(x.reshape(B, 2, total // lane, lane))  # free reshape
        return out.reshape(B, H, W)

    # H*W has no multiple-of-128 factorization: tile (H, W) directly.  Edge
    # blocks (and lanes when W < 128) are masked by Pallas — no padded HBM
    # copy, no extra round trip.
    return _run_flat(x)


def _check(key, B, H, W):
    k1, k2 = jax.random.split(key)
    theta = jax.random.uniform(k1, (B, H, W), jnp.float32,
                               minval=-jnp.pi, maxval=jnp.pi)
    noise = 0.1 * jax.random.normal(k2, (B, 2, H, W), jnp.float32)
    x = jnp.stack([jnp.sin(theta), jnp.cos(theta)], axis=1) + noise

    out = sincos_to_angle(x)
    jax.block_until_ready(out)

    ref = jnp.arctan2(x[:, 0], x[:, 1])
    assert out.shape == (B, H, W)
    assert jnp.allclose(out, ref, atol=1e-5, rtol=1e-5)


if __name__ == "__main__":
    key = jax.random.PRNGKey(0)
    keys = jax.random.split(key, 3)
    # Main small case (matches the module's expected NCHW input).
    _check(keys[0], B=2, H=16, W=16)
    # Larger lane width (H*W divisible by 1024).
    _check(keys[1], B=2, H=64, W=48)
    # H*W not a multiple of 128 -> direct (B, 2, H, W) tiling path.
    _check(keys[2], B=2, H=9, W=7)
    print("KERNEL_OK")
</pallas_src>

<mosaic_0001>
module attributes {stable_mosaic.version = 11 : i64} {
  func.func @_sincos_to_angle_kernel(%arg0: i32, %arg1: i32, %arg2: memref<2x2x1x256xf32, #tpu.memory_space<vmem>>, %arg3: memref<2x1x256xf32, #tpu.memory_space<vmem>>) attributes {dimension_semantics = [#tpu.dimension_semantics<parallel>, #tpu.dimension_semantics<parallel>], iteration_bounds = array<i64: 1, 1>, scalar_prefetch = 0 : i64, scratch_operands = 0 : i64, tpu.core_type = #tpu.core_type<tc>, window_params = [{transform_indices = @transform_0, window_bounds = array<i64: 2, 2, 1, 256>}, {transform_indices = @transform_1, window_bounds = array<i64: 2, 1, 256>}]} {
    %c0 = arith.constant 0 : index
    %c0_0 = arith.constant 0 : index
    %c0_1 = arith.constant 0 : index
    %c0_2 = arith.constant 0 : index
    %0 = vector.load %arg2[%c0, %c0_0, %c0_1, %c0_2] : memref<2x2x1x256xf32, #tpu.memory_space<vmem>>, vector<2x1x1x256xf32>
    %1 = vector.shape_cast %0 : vector<2x1x1x256xf32> to vector<2x1x256xf32>
    %c0_3 = arith.constant 0 : index
    %c1 = arith.constant 1 : index
    %c0_4 = arith.constant 0 : index
    %c0_5 = arith.constant 0 : index
    %2 = vector.load %arg2[%c0_3, %c1, %c0_4, %c0_5] : memref<2x2x1x256xf32, #tpu.memory_space<vmem>>, vector<2x1x1x256xf32>
    %3 = vector.shape_cast %2 : vector<2x1x1x256xf32> to vector<2x1x256xf32>
    %4 = math.absf %1 : vector<2x1x256xf32>
    %5 = math.absf %3 : vector<2x1x256xf32>
    %6 = arith.minimumf %4, %5 : vector<2x1x256xf32>
    %7 = arith.maximumf %4, %5 : vector<2x1x256xf32>
    %cst = arith.constant 0.414213568 : f32
    %8 = vector.broadcast %cst : f32 to vector<2x1x256xf32>
    %9 = arith.mulf %7, %8 : vector<2x1x256xf32>
    %10 = arith.cmpf ogt, %6, %9 : vector<2x1x256xf32>
    %11 = arith.subf %6, %7 : vector<2x1x256xf32>
    %12 = arith.select %10, %11, %6 : vector<2x1x256xi1>, vector<2x1x256xf32>
    %13 = arith.addf %6, %7 : vector<2x1x256xf32>
    %14 = arith.select %10, %13, %7 : vector<2x1x256xi1>, vector<2x1x256xf32>
    %cst_6 = arith.constant 1.17549435E-38 : f32
    %15 = vector.broadcast %cst_6 : f32 to vector<2x1x256xf32>
    %16 = arith.maximumf %14, %15 : vector<2x1x256xf32>
    %17 = tpu.reciprocal %16 {approx = true} : vector<2x1x256xf32> -> vector<2x1x256xf32>
    %18 = arith.mulf %16, %17 : vector<2x1x256xf32>
    %cst_7 = arith.constant 2.000000e+00 : f32
    %19 = vector.broadcast %cst_7 : f32 to vector<2x1x256xf32>
    %20 = arith.subf %19, %18 : vector<2x1x256xf32>
    %21 = arith.mulf %17, %20 : vector<2x1x256xf32>
    %22 = arith.mulf %12, %21 : vector<2x1x256xf32>
    %23 = arith.mulf %22, %22 : vector<2x1x256xf32>
    %cst_8 = arith.constant 0.0805374458 : f32
    %24 = vector.broadcast %cst_8 : f32 to vector<2x1x256xf32>
    %25 = arith.mulf %24, %23 : vector<2x1x256xf32>
    %cst_9 = arith.constant -0.138776854 : f32
    %26 = vector.broadcast %cst_9 : f32 to vector<2x1x256xf32>
    %27 = arith.addf %25, %26 : vector<2x1x256xf32>
    %28 = arith.mulf %27, %23 : vector<2x1x256xf32>
    %cst_10 = arith.constant 0.199777111 : f32
    %29 = vector.broadcast %cst_10 : f32 to vector<2x1x256xf32>
    %30 = arith.addf %28, %29 : vector<2x1x256xf32>
    %31 = arith.mulf %30, %23 : vector<2x1x256xf32>
    %cst_11 = arith.constant -0.333329499 : f32
    %32 = vector.broadcast %cst_11 : f32 to vector<2x1x256xf32>
    %33 = arith.addf %31, %32 : vector<2x1x256xf32>
    %34 = arith.mulf %33, %23 : vector<2x1x256xf32>
    %35 = arith.mulf %34, %22 : vector<2x1x256xf32>
    %36 = arith.addf %35, %22 : vector<2x1x256xf32>
    %cst_12 = arith.constant 0.785398185 : f32
    %37 = vector.broadcast %cst_12 : f32 to vector<2x1x256xf32>
    %38 = arith.addf %37, %36 : vector<2x1x256xf32>
    %39 = arith.select %10, %38, %36 : vector<2x1x256xi1>, vector<2x1x256xf32>
    %40 = arith.cmpf ogt, %4, %5 : vector<2x1x256xf32>
    %cst_13 = arith.constant 1.57079637 : f32
    %41 = vector.broadcast %cst_13 : f32 to vector<2x1x256xf32>
    %42 = arith.subf %41, %39 : vector<2x1x256xf32>
    %43 = arith.select %40, %42, %39 : vector<2x1x256xi1>, vector<2x1x256xf32>
    %cst_14 = arith.constant 0.000000e+00 : f32
    %44 = vector.broadcast %cst_14 : f32 to vector<2x1x256xf32>
    %45 = arith.cmpf olt, %3, %44 : vector<2x1x256xf32>
    %cst_15 = arith.constant 3.14159274 : f32
    %46 = vector.broadcast %cst_15 : f32 to vector<2x1x256xf32>
    %47 = arith.subf %46, %43 : vector<2x1x256xf32>
    %48 = arith.select %45, %47, %43 : vector<2x1x256xi1>, vector<2x1x256xf32>
    %cst_16 = arith.constant 0.000000e+00 : f32
    %49 = vector.broadcast %cst_16 : f32 to vector<2x1x256xf32>
    %50 = arith.cmpf olt, %1, %49 : vector<2x1x256xf32>
    %cst_17 = arith.constant 0.000000e+00 : f32
    %51 = vector.broadcast %cst_17 : f32 to vector<2x1x256xf32>
    %52 = arith.subf %51, %48 : vector<2x1x256xf32>
    %53 = arith.select %50, %52, %48 : vector<2x1x256xi1>, vector<2x1x256xf32>
    %c0_18 = arith.constant 0 : index
    %c0_19 = arith.constant 0 : index
    %c0_20 = arith.constant 0 : index
    %54 = vector.load %arg3[%c0_18, %c0_19, %c0_20] : memref<2x1x256xf32, #tpu.memory_space<vmem>>, vector<2x1x256xf32>
    tpu.vector_store %arg3[%c0_18, %c0_19, %c0_20], %53 {strides = array<i32>} : memref<2x1x256xf32, #tpu.memory_space<vmem>>, vector<2x1x256xf32>,
    return
  }
  func.func @transform_0(%arg0: i32, %arg1: i32) -> (i32, i32, i32, i32) {
    %c0_i32 = arith.constant 0 : i32
    %c0_i32_0 = arith.constant 0 : i32
    %c0_i32_1 = arith.constant 0 : i32
    return %arg0, %c0_i32, %arg1, %c0_i32_0 : i32, i32, i32, i32
  }
  func.func @transform_1(%arg0: i32, %arg1: i32) -> (i32, i32, i32) {
    %c0_i32 = arith.constant 0 : i32
    %c0_i32_0 = arith.constant 0 : i32
    return %arg0, %arg1, %c0_i32 : i32, i32, i32
  }
}

</mosaic_0001>

<bundles_post_ra>
// kernel: tpu_custom_call.1
= control target key start
LH: loop header
LB: loop body
LE: loop exit
PB: predicated region body
PF: predicated region fallthrough
CT: control target
= control target key end

     0   :  { %6 = vsyncpa [#allocation3], 0  ;;  %s257_s0 = inlined_call_operand.hbm [shape: f32[2,2,1,256], index: 0, kind: input, shape index: {}]   ;;  %s258_s1 = inlined_call_operand.hbm [shape: f32[2,1,256], index: 1, kind: output, shape index: {}]  }
   0x1   :  { %7 = vsyncpa [#allocation4], 0  ;;  %s12_s8 = sshll.u32 %s257_s0, 4  ;;  %s189_s9 = smov [#allocation2]   ;;  %s13_s8 = int_to_ptr.hbm [resolvable:$true] %s12_s8 }
   0x2   :  { %s14_s10 = sshll.u32 %s189_s9, 4  ;;  %s190_s11 = smov 32   ;;  %s15_s10 = int_to_ptr.vmem [resolvable:$true] %s14_s10 }
   0x3   :  { %s191_s12 = smov 2  }
   0x4   :  { %20 = dma.hbm_to_vmem [thread:$0]  %s13_s8, 128, %s15_s10, [#allocation3], %s190_s11, %s190_s11, %s191_s12  }
   0x5   :  { %185 = dma.done.wait [#allocation3], 128  }
   0x6   :  { %186 = vsyncadd [#allocation3], 4294967168  ;;  %v209_v0 = vld [vmem:[#allocation2] sm:$0x3]  ;;  %v211_v1 = vld [vmem:[#allocation2 + $0x2] sm:$0x3]  ;;  %v104_v61 = vlaneseq }
   0x7   :  { %v213_v2 = vld [vmem:[#allocation2 + $0x4] sm:$0x3]  ;;  %v216_v3 = vand.u32 2147483647, %v209_v0  ;;  %v219_v4 = vand.u32 2147483647, %v211_v1 }
   0x8   :  { %v221_v5 = vld [vmem:[#allocation2 + $0x6] sm:$0x3]  ;;  %v224_v6 = vand.u32 2147483647, %v213_v2  ;;  %vm92_vm4 = vcmp.lt.f32.partialorder %v211_v1, 0.0  ;;  %vm98_vm6 = vcmp.lt.f32.partialorder %v209_v0, 0.0 }
   0x9   :  { %v227_v7 = vand.u32 2147483647, %v221_v5  ;;  %v34_v8 = vmin.f32 %v216_v3, %v219_v4  ;;  %v36_v9 = vmax.f32 %v216_v3, %v219_v4  ;;  %vm86_vm2 = vcmp.gt.f32.partialorder %v216_v3, %v219_v4  ;;  %s192_s0 = smov [#allocation5]   ;;  %s116_s16 = sshll.u32 %s258_s1, 4  ;;  %s117_s16 = int_to_ptr.hbm [resolvable:$true] %s116_s16 }
   0xa   :  { %vm93_vm5 = vcmp.lt.f32.partialorder %v221_v5, 0.0  ;;  %s114_s13 = sshll.u32 %s192_s0, 4  ;;  %vm106_vm7 = vcmp.lt.s32.totalorder %v104_v61, 256  ;;  %vm99_vm8 = vcmp.lt.f32.partialorder %v213_v2, 0.0  ;;  %s115_s13 = int_to_ptr.vmem [resolvable:$true] %s114_s13 }
   0xb   :  { %v35_v10 = vmin.f32 %v224_v6, %v227_v7  ;;  %v37_v11 = vmax.f32 %v224_v6, %v227_v7  ;;  %v38_v12 = vmul.f32 0.41421357, %v36_v9  ;;  %v46_v13 = vadd.f32 %v36_v9, %v34_v8 }
   0xc   :  { %v42_v21 = vsub.f32 %v34_v8, %v36_v9  ;;  %vm87_vm3 = vcmp.gt.f32.partialorder %v224_v6, %v227_v7 }
   0xd   :  { %v39_v14 = vmul.f32 0.41421357, %v37_v11  ;;  %v47_v15 = vadd.f32 %v37_v11, %v35_v10  ;;  %vm40_vm0 = vcmp.gt.f32.partialorder %v34_v8, %v38_v12  ;;  %v43_v24 = vsub.f32 %v35_v10, %v37_v11 }
   0xe   :  { %v48_v16 = vsel %vm40_vm0, %v46_v13, %v36_v9  ;;  %v44_v27 = vsel %vm40_vm0, %v42_v21, %v34_v8 }
   0xf   :  { %vm41_vm1 = vcmp.gt.f32.partialorder %v35_v10, %v39_v14  ;;  %v50_v17 = vmax.f32 %v48_v16, 1.1754944e-38 }
  0x10   :  { %v49_v18 = vsel %vm41_vm1, %v47_v15, %v37_v11  ;;  %v45_v30 = vsel %vm41_vm1, %v43_v24, %v35_v10 }
  0x11   :  { %v51_v19 = vmax.f32 %v49_v18, 1.1754944e-38  ;;  %133 = vrcp.f32 %v50_v17 }
  0x13   :  { %135 = vrcp.f32 %v51_v19 }
  0x17   :  { %v134_v20 = vpop.eup %133 }
  0x18   :  { %v54_v23 = vmul.f32 %v134_v20, %v50_v17 }
  0x19   :  { %v136_v22 = vpop.eup %135 }
  0x1a   :  { %v55_v25 = vmul.f32 %v136_v22, %v51_v19  ;;  %v56_v26 = vsub.f32 2.0, %v54_v23 }
  0x1c   :  { %v57_v28 = vsub.f32 2.0, %v55_v25  ;;  %v58_v29 = vmul.f32 %v134_v20, %v56_v26 }
  0x1e   :  { %v59_v31 = vmul.f32 %v136_v22, %v57_v28  ;;  %v60_v32 = vmul.f32 %v58_v29, %v44_v27 }
  0x20   :  { %v61_v33 = vmul.f32 %v59_v31, %v45_v30  ;;  %v62_v34 = vmul.f32 %v60_v32, %v60_v32 }
  0x22   :  { %v63_v35 = vmul.f32 %v61_v33, %v61_v33  ;;  %v64_v36 = vmul.f32 0.080537446, %v62_v34 }
  0x24   :  { %v65_v37 = vmul.f32 0.080537446, %v63_v35  ;;  %v66_v38 = vadd.f32 -0.13877685, %v64_v36 }
  0x26   :  { %v67_v39 = vadd.f32 -0.13877685, %v65_v37  ;;  %v68_v40 = vmul.f32 %v66_v38, %v62_v34 }
  0x28   :  { %v69_v41 = vmul.f32 %v67_v39, %v63_v35  ;;  %v70_v42 = vadd.f32 0.19977711, %v68_v40 }
  0x2a   :  { %v71_v43 = vadd.f32 0.19977711, %v69_v41  ;;  %v72_v44 = vmul.f32 %v70_v42, %v62_v34 }
  0x2c   :  { %v73_v45 = vmul.f32 %v71_v43, %v63_v35  ;;  %v74_v46 = vadd.f32 -0.3333295, %v72_v44 }
  0x2e   :  { %v75_v47 = vadd.f32 -0.3333295, %v73_v45  ;;  %v76_v48 = vmul.f32 %v74_v46, %v62_v34 }
  0x30   :  { %v77_v49 = vmul.f32 %v75_v47, %v63_v35  ;;  %v78_v50 = vmul.f32 %v76_v48, %v60_v32 }
  0x32   :  { %v79_v51 = vmul.f32 %v77_v49, %v61_v33  ;;  %v80_v52 = vadd.f32 %v78_v50, %v60_v32 }
  0x34   :  { %v81_v53 = vadd.f32 %v79_v51, %v61_v33  ;;  %v82_v54 = vadd.f32 0.7853982, %v80_v52 }
  0x36   :  { %v83_v55 = vadd.f32 0.7853982, %v81_v53  ;;  %v84_v56 = vsel %vm40_vm0, %v82_v54, %v80_v52 }
  0x37   :  { %v88_v57 = vsub.f32 1.5707964, %v84_v56 }
  0x38   :  { %v85_v58 = vsel %vm41_vm1, %v83_v55, %v81_v53 }
  0x39   :  { %v89_v59 = vsub.f32 1.5707964, %v85_v58  ;;  %v90_v60 = vsel %vm86_vm2, %v88_v57, %v84_v56 }
  0x3a   :  { %v94_v62 = vsub.f32 3.1415927, %v90_v60 }
  0x3b   :  { %v91_v63 = vsel %vm87_vm3, %v89_v59, %v85_v58 }
  0x3c   :  { %v95_v8 = vsub.f32 3.1415927, %v91_v63  ;;  %v96_v9 = vsel %vm92_vm4, %v94_v62, %v90_v60 }
  0x3d   :  { %v100_v3 = vsub.f32 0.0, %v96_v9 }
  0x3e   :  { %v97_v4 = vsel %vm93_vm5, %v95_v8, %v91_v63 }
  0x3f   :  { %v101_v1 = vsub.f32 0.0, %v97_v4  ;;  %v102_v6 = vsel %vm98_vm6, %v100_v3, %v96_v9 }
  0x40   :  { %108 = vst.msk [vmem:[#allocation5] sm:$0x3] %vm106_vm7, %v102_v6 }
  0x41   :  { %v103_v5 = vsel %vm99_vm8, %v101_v1, %v97_v4 }
  0x42   :  { %109 = vst.msk [vmem:[#allocation5 + $0x2] sm:$0x3] %vm106_vm7, %v103_v5 }
  0x43   :  { %122 = dma.vmem_to_hbm [thread:$0]  %s115_s13, 64, %s117_s16, [#allocation4], %s190_s11, %s190_s11, %s191_s12  }
  0x44   :  { %187 = dma.done.wait [#allocation4], 64  }
  0x45   :  { %188 = vsyncadd [#allocation4], 4294967232 }
  0x46   :  { %127 = vsyncpa [#allocation3], 1 }
  0x47   :  { %128 = vsyncpa [#allocation4], 1 }

</bundles_post_ra>
